<compile_context>
chip_gen: v6e
topology: v6e:2x2x1
jax: 0.10.0
libtpu: 0.0.40
codegen_flags: <defaults>
</compile_context>

<pallas_src>
import functools

import jax
import jax.numpy as jnp
import numpy as np
from jax import lax
from jax.experimental import pallas as pl
from jax.experimental.pallas import tpu as pltpu


def _adaptive_loss_kernel(pred_ref, targ_ref, mask_ref, temp_ref, out_ref, *,
                          use_magnitude_weights: bool):
    # (TB, L) tile; L = 2*N with H on even lanes, C on odd lanes.
    pred = pred_ref[...].astype(jnp.float32)
    targ = targ_ref[...].astype(jnp.float32)
    mask = mask_ref[...].astype(jnp.float32)
    inv_temp = 1.0 / temp_ref[0]                 # single scalar divide (SMEM)

    diff = pred - targ
    abs_err = jnp.abs(diff)

    # nn.HuberLoss(reduction='none', delta=1.0)
    huber = jnp.where(abs_err <= 1.0, 0.5 * diff * diff, abs_err - 0.5)

    # Channel selectors from lane parity (even lane = H / channel 0).
    lane = lax.broadcasted_iota(jnp.int32, pred.shape, 1)
    is_h = (lane % 2) == 0
    sel_h = is_h.astype(jnp.float32)
    sel_c = 1.0 - sel_h

    # Softmax over the atom axis per (row=batch, channel)  == torch dim=1.
    neg = jnp.float32(-1e30)
    logits = abs_err * inv_temp
    m_h = jnp.max(jnp.where(is_h, logits, neg), axis=-1, keepdims=True)
    m_c = jnp.max(jnp.where(is_h, neg, logits), axis=-1, keepdims=True)
    ex = jnp.exp(logits - jnp.where(is_h, m_h, m_c))
    den_h = jnp.sum(ex * sel_h, axis=-1, keepdims=True)
    den_c = jnp.sum(ex * sel_c, axis=-1, keepdims=True)
    w = ex * (sel_h * pl.reciprocal(den_h, approx=False)
              + sel_c * pl.reciprocal(den_c, approx=False))

    # Mask + renormalize per (row, channel):  w / (sum(w) + 1e-6)
    w = w * mask
    ws_h = jnp.sum(w * sel_h, axis=-1, keepdims=True)
    ws_c = jnp.sum(w * sel_c, axis=-1, keepdims=True)
    w = w * (sel_h * pl.reciprocal(ws_h + 1e-6, approx=False)
             + sel_c * pl.reciprocal(ws_c + 1e-6, approx=False))

    weighted = huber * w
    if use_magnitude_weights:  # config.training.nmr_loss_reduction == 'weighted'
        weighted = weighted * (1.0 + jnp.abs(targ) * jnp.float32(1.0 / 50.0))
    masked_loss = weighted * mask

    h_loss = jnp.sum(masked_loss * sel_h)
    c_loss = jnp.sum(masked_loss * sel_c)
    h_msk = jnp.sum(mask * sel_h)
    c_msk = jnp.sum(mask * sel_c)

    # Lane-dense per-tile partials: lanes 0..3 = [h_loss, h_mask, c_loss, c_mask]
    out_lane = lax.broadcasted_iota(jnp.int32, out_ref.shape, 2)
    out_ref[...] = (jnp.where(out_lane == 0, h_loss, 0.0)
                    + jnp.where(out_lane == 1, h_msk, 0.0)
                    + jnp.where(out_lane == 2, c_loss, 0.0)
                    + jnp.where(out_lane == 3, c_msk, 0.0))


def _round_up(x, m):
    return (x + m - 1) // m * m


def adaptive_loss(pred_shifts, target_shifts, nmr_mask, temperature,
                  nmr_loss_reduction="weighted"):
    B, N, C = pred_shifts.shape
    assert C == 2, "expects (B, N, 2) NMR shifts (H and C channels)"
    L = N * C

    # Free, contiguous reshapes only — no transpose, no wrapper-side upcast.
    pred2 = pred_shifts.reshape(B, L)
    targ2 = target_shifts.reshape(B, L)
    mask2 = nmr_mask.reshape(B, L)

    # Row tile: multiple of 8, capped so double-buffered inputs stay well under
    # the smallest (v7x) scoped-VMEM budget.
    row_bytes = L * (pred2.dtype.itemsize + targ2.dtype.itemsize
                     + mask2.dtype.itemsize)
    vmem_budget = 12 * 1024 * 1024
    tb_cap = max(8, (vmem_budget // max(2 * row_bytes, 1)) // 8 * 8)
    TB = int(min(256, tb_cap, _round_up(B, 8)))
    Bp = _round_up(B, TB)
    if Bp != B:
        pad = ((0, Bp - B), (0, 0))
        pred2 = jnp.pad(pred2, pad)
        targ2 = jnp.pad(targ2, pad)
        mask2 = jnp.pad(mask2, pad)      # zero-mask rows contribute nothing
    G = Bp // TB

    temp = jnp.asarray(temperature, jnp.float32).reshape(1)

    kernel = functools.partial(
        _adaptive_loss_kernel,
        use_magnitude_weights=(nmr_loss_reduction == "weighted"),
    )

    tile_sums = pl.pallas_call(
        kernel,
        grid=(G,),
        in_specs=[
            pl.BlockSpec((TB, L), lambda i: (i, 0)),
            pl.BlockSpec((TB, L), lambda i: (i, 0)),
            pl.BlockSpec((TB, L), lambda i: (i, 0)),
            pl.BlockSpec(memory_space=pltpu.MemorySpace.SMEM),   # temperature
        ],
        out_specs=pl.BlockSpec((1, 8, 128), lambda i: (i, 0, 0)),
        out_shape=jax.ShapeDtypeStruct((G, 8, 128), jnp.float32),
        compiler_params=pltpu.CompilerParams(
            dimension_semantics=("parallel",),
            vmem_limit_bytes=32 * 1024 * 1024),
    )(pred2, targ2, mask2, temp)

    sums = tile_sums[:, 0, :]                      # (G, 128); lanes 0..3 used
    h_loss_sum = jnp.sum(sums[:, 0])
    h_mask_sum = jnp.sum(sums[:, 1])
    c_loss_sum = jnp.sum(sums[:, 2])
    c_mask_sum = jnp.sum(sums[:, 3])

    total_sum = h_loss_sum + c_loss_sum
    num_valid = h_mask_sum + c_mask_sum
    total_loss = jnp.where(num_valid > 0,
                           total_sum / jnp.maximum(num_valid, 1e-30),
                           0.0)
    h_loss = h_loss_sum / (h_mask_sum + 1e-6)
    c_loss = c_loss_sum / (c_mask_sum + 1e-6)

    return {
        "total_loss": total_loss,
        "nmr_loss": total_loss,
        "h_nmr_loss": h_loss,
        "c_nmr_loss": c_loss,
        # jnp scalar (jit/trace-safe), not float(): temperature is a learnable
        # parameter in the torch model and may be a traced array here.
        "temperature": jnp.asarray(temperature, jnp.float32),
    }


def _reference(pred, targ, mask, temp, weighted=True):
    """Pure-JAX mirror of the torch forward (for a correctness check)."""
    diff = pred - targ
    abs_err = jnp.abs(diff)
    loss = jnp.where(abs_err <= 1.0, 0.5 * diff * diff, abs_err - 0.5)
    w = jax.nn.softmax(abs_err / temp, axis=1)
    w = w * mask
    w = w / (w.sum(axis=1, keepdims=True) + 1e-6)
    wl = loss * w
    if weighted:
        wl = wl * (1.0 + jnp.abs(targ) / 50.0)
    ml = wl * mask
    nv = mask.sum()
    total = jnp.where(nv > 0, ml.sum() / nv, 0.0)
    h = ml[:, :, 0].sum() / (mask[:, :, 0].sum() + 1e-6)
    c = ml[:, :, 1].sum() / (mask[:, :, 1].sum() + 1e-6)
    return total, h, c


if __name__ == "__main__":
    key = jax.random.PRNGKey(0)
    k1, k2, k3 = jax.random.split(key, 3)

    B, N = 4, 64  # batch=4, 64 atoms, 2 NMR channels (H, C)
    pred = jax.random.normal(k1, (B, N, 2), jnp.float32) * 3.0
    targ = jax.random.normal(k2, (B, N, 2), jnp.float32) * 3.0
    mask_bool = jax.random.uniform(k3, (B, N, 2)) > 0.3
    mask_i8 = mask_bool.astype(jnp.int8)       # narrow mask dtype for the kernel
    mask_f32 = mask_bool.astype(jnp.float32)   # reference uses a float mask

    temperature = 1.0  # nn.Parameter(torch.tensor(1.0)) — deterministic init

    out = adaptive_loss(pred, targ, mask_i8, temperature,
                        nmr_loss_reduction="weighted")
    jax.block_until_ready(out["total_loss"])

    # sanity-check against the pure-JAX reference of the torch semantics
    ref_total, ref_h, ref_c = _reference(pred, targ, mask_f32, temperature, True)
    np.testing.assert_allclose(np.asarray(out["total_loss"]),
                               np.asarray(ref_total), rtol=2e-5, atol=1e-6)
    np.testing.assert_allclose(np.asarray(out["h_nmr_loss"]),
                               np.asarray(ref_h), rtol=2e-5, atol=1e-6)
    np.testing.assert_allclose(np.asarray(out["c_nmr_loss"]),
                               np.asarray(ref_c), rtol=2e-5, atol=1e-6)

    print("KERNEL_OK")
</pallas_src>

<mosaic_0001>
module attributes {stable_mosaic.version = 11 : i64} {
  func.func @_adaptive_loss_kernel(%arg0: i32, %arg1: memref<8x128xf32, #tpu.memory_space<vmem>>, %arg2: memref<8x128xf32, #tpu.memory_space<vmem>>, %arg3: memref<8x128xi8, #tpu.memory_space<vmem>>, %arg4: memref<1xf32, #tpu.memory_space<smem>>, %arg5: memref<1x8x128xf32, #tpu.memory_space<vmem>>) attributes {dimension_semantics = [#tpu.dimension_semantics<parallel>], iteration_bounds = array<i64: 1>, scalar_prefetch = 0 : i64, scratch_operands = 0 : i64, tpu.core_type = #tpu.core_type<tc>, window_params = [{transform_indices = @transform_0, window_bounds = array<i64: 8, 128>}, {transform_indices = @transform_1, window_bounds = array<i64: 8, 128>}, {transform_indices = @transform_2, window_bounds = array<i64: 8, 128>}, {transform_indices = @transform_3, window_bounds = array<i64: 1>}, {transform_indices = @transform_4, window_bounds = array<i64: 1, 8, 128>}]} {
    %c0 = arith.constant 0 : index
    %c0_0 = arith.constant 0 : index
    %0 = vector.load %arg1[%c0, %c0_0] : memref<8x128xf32, #tpu.memory_space<vmem>>, vector<8x128xf32>
    %c0_1 = arith.constant 0 : index
    %c0_2 = arith.constant 0 : index
    %1 = vector.load %arg2[%c0_1, %c0_2] : memref<8x128xf32, #tpu.memory_space<vmem>>, vector<8x128xf32>
    %c0_3 = arith.constant 0 : index
    %c0_4 = arith.constant 0 : index
    %2 = vector.load %arg3[%c0_3, %c0_4] : memref<8x128xi8, #tpu.memory_space<vmem>>, vector<8x128xi8>
    %3 = arith.sitofp %2 : vector<8x128xi8> to vector<8x128xf32>
    %c0_5 = arith.constant 0 : index
    %4 = memref.load %arg4[%c0_5] : memref<1xf32, #tpu.memory_space<smem>>
    %cst = arith.constant 1.000000e+00 : f32
    %5 = arith.divf %cst, %4 : f32
    %6 = arith.subf %0, %1 : vector<8x128xf32>
    %7 = math.absf %6 : vector<8x128xf32>
    %cst_6 = arith.constant 1.000000e+00 : f32
    %8 = vector.broadcast %cst_6 : f32 to vector<8x128xf32>
    %9 = arith.cmpf ole, %7, %8 : vector<8x128xf32>
    %cst_7 = arith.constant 5.000000e-01 : f32
    %10 = vector.broadcast %cst_7 : f32 to vector<8x128xf32>
    %11 = arith.mulf %10, %6 : vector<8x128xf32>
    %12 = arith.mulf %11, %6 : vector<8x128xf32>
    %cst_8 = arith.constant 5.000000e-01 : f32
    %13 = vector.broadcast %cst_8 : f32 to vector<8x128xf32>
    %14 = arith.subf %7, %13 : vector<8x128xf32>
    %15 = arith.select %9, %12, %14 : vector<8x128xi1>, vector<8x128xf32>
    %16 = tpu.iota {dimensions = array<i32: 1>} : vector<8x128xi32>
    %c2_i32 = arith.constant 2 : i32
    %c0_i32 = arith.constant 0 : i32
    %17 = arith.cmpi eq, %c2_i32, %c0_i32 : i32
    %c1_i32 = arith.constant 1 : i32
    %18 = arith.select %17, %c1_i32, %c2_i32 : i32
    %19 = vector.broadcast %18 : i32 to vector<8x128xi32>
    %20 = arith.remsi %16, %19 : vector<8x128xi32>
    %c0_i32_9 = arith.constant 0 : i32
    %21 = vector.broadcast %c0_i32_9 : i32 to vector<8x128xi32>
    %22 = arith.cmpi ne, %20, %21 : vector<8x128xi32>
    %c0_i32_10 = arith.constant 0 : i32
    %23 = vector.broadcast %c0_i32_10 : i32 to vector<8x128xi32>
    %24 = arith.cmpi slt, %20, %23 : vector<8x128xi32>
    %c0_i32_11 = arith.constant 0 : i32
    %25 = arith.cmpi slt, %18, %c0_i32_11 : i32
    %26 = vector.broadcast %25 : i1 to vector<8x128xi1>
    %27 = vector.broadcast %26 : vector<8x128xi1> to vector<8x128xi1>
    %28 = arith.xori %24, %27 : vector<8x128xi1>
    %29 = arith.andi %28, %22 : vector<8x128xi1>
    %30 = vector.broadcast %18 : i32 to vector<8x128xi32>
    %31 = arith.addi %20, %30 : vector<8x128xi32>
    %32 = arith.select %29, %31, %20 : vector<8x128xi1>, vector<8x128xi32>
    %c0_i32_12 = arith.constant 0 : i32
    %33 = vector.broadcast %c0_i32_12 : i32 to vector<8x128xi32>
    %34 = arith.cmpi eq, %32, %33 : vector<8x128xi32>
    %35 = arith.extui %34 : vector<8x128xi1> to vector<8x128xi32>
    %36 = arith.sitofp %35 : vector<8x128xi32> to vector<8x128xf32>
    %cst_13 = arith.constant 1.000000e+00 : f32
    %37 = vector.broadcast %cst_13 : f32 to vector<8x128xf32>
    %38 = arith.subf %37, %36 : vector<8x128xf32>
    %39 = vector.broadcast %5 : f32 to vector<8x128xf32>
    %40 = arith.mulf %7, %39 : vector<8x128xf32>
    %cst_14 = arith.constant -1.000000e+30 : f32
    %41 = vector.broadcast %cst_14 : f32 to vector<8x128xf32>
    %42 = arith.select %34, %40, %41 : vector<8x128xi1>, vector<8x128xf32>
    %cst_15 = arith.constant dense<0xFF800000> : vector<8xf32>
    %43 = vector.multi_reduction <maximumf>, %42, %cst_15 [1] : vector<8x128xf32> to vector<8xf32>
    %44 = vector.shape_cast %43 : vector<8xf32> to vector<8x1xf32>
    %cst_16 = arith.constant -1.000000e+30 : f32
    %45 = vector.broadcast %cst_16 : f32 to vector<8x128xf32>
    %46 = arith.select %34, %45, %40 : vector<8x128xi1>, vector<8x128xf32>
    %cst_17 = arith.constant dense<0xFF800000> : vector<8xf32>
    %47 = vector.multi_reduction <maximumf>, %46, %cst_17 [1] : vector<8x128xf32> to vector<8xf32>
    %48 = vector.shape_cast %47 : vector<8xf32> to vector<8x1xf32>
    %49 = vector.shape_cast %44 : vector<8x1xf32> to vector<8x1xf32>
    %50 = vector.broadcast %49 : vector<8x1xf32> to vector<8x128xf32>
    %51 = vector.shape_cast %48 : vector<8x1xf32> to vector<8x1xf32>
    %52 = vector.broadcast %51 : vector<8x1xf32> to vector<8x128xf32>
    %53 = arith.select %34, %50, %52 : vector<8x128xi1>, vector<8x128xf32>
    %54 = arith.subf %40, %53 : vector<8x128xf32>
    %55 = math.exp %54 : vector<8x128xf32>
    %56 = arith.mulf %55, %36 : vector<8x128xf32>
    %cst_18 = arith.constant dense<0.000000e+00> : vector<8xf32>
    %57 = vector.multi_reduction <add>, %56, %cst_18 [1] : vector<8x128xf32> to vector<8xf32>
    %58 = vector.shape_cast %57 : vector<8xf32> to vector<8x1xf32>
    %59 = arith.mulf %55, %38 : vector<8x128xf32>
    %cst_19 = arith.constant dense<0.000000e+00> : vector<8xf32>
    %60 = vector.multi_reduction <add>, %59, %cst_19 [1] : vector<8x128xf32> to vector<8xf32>
    %61 = vector.shape_cast %60 : vector<8xf32> to vector<8x1xf32>
    %62 = tpu.reciprocal %58 : vector<8x1xf32> -> vector<8x1xf32>
    %63 = vector.broadcast %62 : vector<8x1xf32> to vector<8x128xf32>
    %64 = arith.mulf %36, %63 : vector<8x128xf32>
    %65 = tpu.reciprocal %61 : vector<8x1xf32> -> vector<8x1xf32>
    %66 = vector.broadcast %65 : vector<8x1xf32> to vector<8x128xf32>
    %67 = arith.mulf %38, %66 : vector<8x128xf32>
    %68 = arith.addf %64, %67 : vector<8x128xf32>
    %69 = arith.mulf %55, %68 : vector<8x128xf32>
    %70 = arith.mulf %69, %3 : vector<8x128xf32>
    %71 = arith.mulf %70, %36 : vector<8x128xf32>
    %cst_20 = arith.constant dense<0.000000e+00> : vector<8xf32>
    %72 = vector.multi_reduction <add>, %71, %cst_20 [1] : vector<8x128xf32> to vector<8xf32>
    %73 = vector.shape_cast %72 : vector<8xf32> to vector<8x1xf32>
    %74 = arith.mulf %70, %38 : vector<8x128xf32>
    %cst_21 = arith.constant dense<0.000000e+00> : vector<8xf32>
    %75 = vector.multi_reduction <add>, %74, %cst_21 [1] : vector<8x128xf32> to vector<8xf32>
    %76 = vector.shape_cast %75 : vector<8xf32> to vector<8x1xf32>
    %cst_22 = arith.constant 9.99999997E-7 : f32
    %77 = vector.broadcast %cst_22 : f32 to vector<8x1xf32>
    %78 = arith.addf %73, %77 : vector<8x1xf32>
    %79 = tpu.reciprocal %78 : vector<8x1xf32> -> vector<8x1xf32>
    %80 = vector.broadcast %79 : vector<8x1xf32> to vector<8x128xf32>
    %81 = arith.mulf %36, %80 : vector<8x128xf32>
    %cst_23 = arith.constant 9.99999997E-7 : f32
    %82 = vector.broadcast %cst_23 : f32 to vector<8x1xf32>
    %83 = arith.addf %76, %82 : vector<8x1xf32>
    %84 = tpu.reciprocal %83 : vector<8x1xf32> -> vector<8x1xf32>
    %85 = vector.broadcast %84 : vector<8x1xf32> to vector<8x128xf32>
    %86 = arith.mulf %38, %85 : vector<8x128xf32>
    %87 = arith.addf %81, %86 : vector<8x128xf32>
    %88 = arith.mulf %70, %87 : vector<8x128xf32>
    %89 = arith.mulf %15, %88 : vector<8x128xf32>
    %90 = math.absf %1 : vector<8x128xf32>
    %cst_24 = arith.constant 2.000000e-02 : f32
    %91 = vector.broadcast %cst_24 : f32 to vector<8x128xf32>
    %92 = arith.mulf %90, %91 : vector<8x128xf32>
    %cst_25 = arith.constant 1.000000e+00 : f32
    %93 = vector.broadcast %cst_25 : f32 to vector<8x128xf32>
    %94 = arith.addf %93, %92 : vector<8x128xf32>
    %95 = arith.mulf %89, %94 : vector<8x128xf32>
    %96 = arith.mulf %95, %3 : vector<8x128xf32>
    %97 = arith.mulf %96, %36 : vector<8x128xf32>
    %98 = vector.shape_cast %97 : vector<8x128xf32> to vector<1x8x128xf32>
    %cst_26 = arith.constant dense<0.000000e+00> : vector<1xf32>
    %99 = vector.multi_reduction <add>, %98, %cst_26 [1, 2] : vector<1x8x128xf32> to vector<1xf32>
    %100 = vector.shape_cast %99 : vector<1xf32> to vector<1x1x1xf32>
    %101 = vector.extract %100[0, 0, 0] : f32 from vector<1x1x1xf32>
    %102 = arith.mulf %96, %38 : vector<8x128xf32>
    %103 = vector.shape_cast %102 : vector<8x128xf32> to vector<1x8x128xf32>
    %cst_27 = arith.constant dense<0.000000e+00> : vector<1xf32>
    %104 = vector.multi_reduction <add>, %103, %cst_27 [1, 2] : vector<1x8x128xf32> to vector<1xf32>
    %105 = vector.shape_cast %104 : vector<1xf32> to vector<1x1x1xf32>
    %106 = vector.extract %105[0, 0, 0] : f32 from vector<1x1x1xf32>
    %107 = arith.mulf %3, %36 : vector<8x128xf32>
    %108 = vector.shape_cast %107 : vector<8x128xf32> to vector<1x8x128xf32>
    %cst_28 = arith.constant dense<0.000000e+00> : vector<1xf32>
    %109 = vector.multi_reduction <add>, %108, %cst_28 [1, 2] : vector<1x8x128xf32> to vector<1xf32>
    %110 = vector.shape_cast %109 : vector<1xf32> to vector<1x1x1xf32>
    %111 = vector.extract %110[0, 0, 0] : f32 from vector<1x1x1xf32>
    %112 = arith.mulf %3, %38 : vector<8x128xf32>
    %113 = vector.shape_cast %112 : vector<8x128xf32> to vector<1x8x128xf32>
    %cst_29 = arith.constant dense<0.000000e+00> : vector<1xf32>
    %114 = vector.multi_reduction <add>, %113, %cst_29 [1, 2] : vector<1x8x128xf32> to vector<1xf32>
    %115 = vector.shape_cast %114 : vector<1xf32> to vector<1x1x1xf32>
    %116 = vector.extract %115[0, 0, 0] : f32 from vector<1x1x1xf32>
    %117 = tpu.iota {dimensions = array<i32: 2>} : vector<1x8x128xi32>
    %c0_i32_30 = arith.constant 0 : i32
    %118 = vector.broadcast %c0_i32_30 : i32 to vector<1x8x128xi32>
    %119 = arith.cmpi eq, %117, %118 : vector<1x8x128xi32>
    %cst_31 = arith.constant 0.000000e+00 : f32
    %120 = vector.broadcast %101 : f32 to vector<1x8x128xf32>
    %121 = vector.broadcast %cst_31 : f32 to vector<1x8x128xf32>
    %122 = arith.select %119, %120, %121 : vector<1x8x128xi1>, vector<1x8x128xf32>
    %c1_i32_32 = arith.constant 1 : i32
    %123 = vector.broadcast %c1_i32_32 : i32 to vector<1x8x128xi32>
    %124 = arith.cmpi eq, %117, %123 : vector<1x8x128xi32>
    %cst_33 = arith.constant 0.000000e+00 : f32
    %125 = vector.broadcast %111 : f32 to vector<1x8x128xf32>
    %126 = vector.broadcast %cst_33 : f32 to vector<1x8x128xf32>
    %127 = arith.select %124, %125, %126 : vector<1x8x128xi1>, vector<1x8x128xf32>
    %128 = arith.addf %122, %127 : vector<1x8x128xf32>
    %c2_i32_34 = arith.constant 2 : i32
    %129 = vector.broadcast %c2_i32_34 : i32 to vector<1x8x128xi32>
    %130 = arith.cmpi eq, %117, %129 : vector<1x8x128xi32>
    %cst_35 = arith.constant 0.000000e+00 : f32
    %131 = vector.broadcast %106 : f32 to vector<1x8x128xf32>
    %132 = vector.broadcast %cst_35 : f32 to vector<1x8x128xf32>
    %133 = arith.select %130, %131, %132 : vector<1x8x128xi1>, vector<1x8x128xf32>
    %134 = arith.addf %128, %133 : vector<1x8x128xf32>
    %c3_i32 = arith.constant 3 : i32
    %135 = vector.broadcast %c3_i32 : i32 to vector<1x8x128xi32>
    %136 = arith.cmpi eq, %117, %135 : vector<1x8x128xi32>
    %cst_36 = arith.constant 0.000000e+00 : f32
    %137 = vector.broadcast %116 : f32 to vector<1x8x128xf32>
    %138 = vector.broadcast %cst_36 : f32 to vector<1x8x128xf32>
    %139 = arith.select %136, %137, %138 : vector<1x8x128xi1>, vector<1x8x128xf32>
    %140 = arith.addf %134, %139 : vector<1x8x128xf32>
    %c0_37 = arith.constant 0 : index
    %c0_38 = arith.constant 0 : index
    %c0_39 = arith.constant 0 : index
    %141 = vector.load %arg5[%c0_37, %c0_38, %c0_39] : memref<1x8x128xf32, #tpu.memory_space<vmem>>, vector<1x8x128xf32>
    tpu.vector_store %arg5[%c0_37, %c0_38, %c0_39], %140 {strides = array<i32>} : memref<1x8x128xf32, #tpu.memory_space<vmem>>, vector<1x8x128xf32>,
    return
  }
  func.func @transform_0(%arg0: i32) -> (i32, i32) {
    %c0_i32 = arith.constant 0 : i32
    %c0_i32_0 = arith.constant 0 : i32
    return %arg0, %c0_i32 : i32, i32
  }
  func.func @transform_1(%arg0: i32) -> (i32, i32) {
    %c0_i32 = arith.constant 0 : i32
    %c0_i32_0 = arith.constant 0 : i32
    return %arg0, %c0_i32 : i32, i32
  }
  func.func @transform_2(%arg0: i32) -> (i32, i32) {
    %c0_i32 = arith.constant 0 : i32
    %c0_i32_0 = arith.constant 0 : i32
    return %arg0, %c0_i32 : i32, i32
  }
  func.func @transform_3(%arg0: i32) -> i32 {
    %c0_i32 = arith.constant 0 : i32
    %c0_i32_0 = arith.constant 0 : i32
    return %c0_i32 : i32
  }
  func.func @transform_4(%arg0: i32) -> (i32, i32, i32) {
    %c0_i32 = arith.constant 0 : i32
    %c0_i32_0 = arith.constant 0 : i32
    %c0_i32_1 = arith.constant 0 : i32
    return %arg0, %c0_i32, %c0_i32_0 : i32, i32, i32
  }
}

</mosaic_0001>

<bundles_post_ra>
// kernel: tpu_custom_call.1
= control target key start
LH: loop header
LB: loop body
LE: loop exit
PB: predicated region body
PF: predicated region fallthrough
CT: control target
= control target key end

     0   :  { %10 = vsyncpa [#allocation4], 0  ;;  %s339_s0 = inlined_call_operand.hbm [shape: f32[8,128], index: 0, kind: input, shape index: {}]   ;;  %s340_s1 = inlined_call_operand.hbm [shape: f32[8,128], index: 1, kind: input, shape index: {}]   ;;  %s341_s2 = inlined_call_operand.vmem [shape: s8[8,128], index: 2, kind: input, shape index: {}]   ;;  %s342_s3 = inlined_call_operand.<no memory space> [shape: f32[1], index: 3, kind: input, shape index: {}]   ;;  %s343_s4 = inlined_call_operand.hbm [shape: f32[1,8,128], index: 4, kind: output, shape index: {}]  }
   0x1   :  { %11 = vsyncpa [#allocation7], 0 }
   0x2   :  { %12 = vsyncpa [#allocation5], 0  ;;  %s288_s15 = smov [#allocation3]   ;;  %s289_s17 = smov [#allocation6]  }
   0x3   :  { %s19_s16 = sshll.u32 %s288_s15, 4  ;;  %s29_s18 = sshll.u32 %s289_s17, 4  ;;  %s20_s16 = int_to_ptr.vmem [resolvable:$true] %s19_s16  ;;  %s30_s18 = int_to_ptr.vmem [resolvable:$true] %s29_s18 }
   0x4   :  { %s230_s19 = scalar_lea.vmem %s20_s16, 128  ;;  %p235_p1 = scmp.lt.s32.totalorder %s20_s16, %s20_s16 }
   0x5   :  { %p231_p0 = scmp.ne.s32.totalorder %s20_s16, %s230_s19  ;;  %p236_p2 = scmp.lt.s32.totalorder %s230_s19, %s230_s19 }
   0x7   :  { %p237_p3 = por %p236_p2, %p235_p1 }
   0x9   :  { %p238_p4 = pnand %p237_p3, %p231_p0 }
   0xb   :  { %241 = shalt.err (!%p238_p4)
}
   0xc   :  { %22 = dma.hbm_to_vmem [thread:$0]  %s339_s0, 128, %s20_s16, [#allocation4]  }
   0xd   :  { %s250_s22 = scalar_lea.vmem %s30_s18, 128  ;;  %p255_p6 = scmp.lt.s32.totalorder %s30_s18, %s30_s18 }
   0xe   :  { %p251_p5 = scmp.ne.s32.totalorder %s30_s18, %s250_s22  ;;  %p256_p7 = scmp.lt.s32.totalorder %s250_s22, %s250_s22 }
  0x10   :  { %p257_p8 = por %p256_p7, %p255_p6 }
  0x12   :  { %p258_p9 = pnand %p257_p8, %p251_p5 }
  0x14   :  { %261 = shalt.err (!%p258_p9)
}
  0x15   :  { %32 = dma.hbm_to_vmem [thread:$0]  %s340_s1, 128, %s30_s18, [#allocation7]  }
  0x16   :  { %282 = dma.done.wait [#allocation4], 128  }
  0x17   :  { %283 = vsyncadd [#allocation4], 4294967168  ;;  %v49_v0 = vstv %s342_s3 }
  0x18   :  { %284 = dma.done.wait [#allocation7], 128  }
  0x19   :  { %285 = vsyncadd [#allocation7], 4294967168  ;;  %210 = vrcp.f32 %v49_v0  ;;  %v59_v2 = vlaneseq  ;;  %v43_v3 = vld [vmem:[#allocation3] sm:$0xff]  ;;  %v44_v4 = vld [vmem:[#allocation6] sm:$0xff]  ;;  %v290_v18 = vmov 0.0   ;;  %s291_s30 = smov [#allocation8]  }
  0x1a   :  { %v52_v6 = vsub.f32 %v43_v3, %v44_v4  ;;  %v45_v26 = vld [vmem:[%s341_s2] sm:$0x3]  ;;  %v117_v43 = vand.u32 2147483647, %v44_v4  ;;  %s184_s5 = sshll.u32 %s291_s30, 4  ;;  %s185_s5 = int_to_ptr.vmem [resolvable:$true] %s184_s5 }
  0x1b   :  { %v326_v5 = vand.u32 127, %v59_v2  ;;  %v46_v28 = vunpack.c.0.s8 %v45_v26  ;;  %s262_s6 = scalar_lea.vmem %s185_s5, 128  ;;  %p267_p11 = scmp.lt.s32.totalorder %s185_s5, %s185_s5 }
  0x1c   :  { %v53_v8 = vand.u32 2147483647, %v52_v6  ;;  %v55_v42 = vmul.f32 0.5, %v52_v6  ;;  %v118_v50 = vmul.f32 0.02, %v117_v43  ;;  %p263_p10 = scmp.ne.s32.totalorder %s185_s5, %s262_s6  ;;  %p268_p12 = scmp.lt.s32.totalorder %s262_s6, %s262_s6 }
  0x1d   :  { %v65_v7 = vand.u32 1, %v326_v5  ;;  %v47_v32 = vcvt.s32.f32 %v46_v28  ;;  %vm162_vm2 = vcmp.eq.s32.totalorder %v326_v5, 0  ;;  %vm165_vm3 = vcmp.eq.s32.totalorder %v326_v5, 1 }
  0x1e   :  { %v194_v46 = vadd.f32 -0.5, %v53_v8  ;;  %v56_v47 = vmul.f32 %v55_v42, %v52_v6  ;;  %vm54_vm1 = vcmp.le.f32.partialorder %v53_v8, 1.0  ;;  %v119_v54 = vadd.f32 1.0, %v118_v50  ;;  %p269_p13 = por %p268_p12, %p267_p11 }
  0x1f   :  { %vm73_vm0 = vcmp.eq.s32.totalorder %v65_v7, 0  ;;  %vm169_vm4 = vcmp.eq.s32.totalorder %v326_v5, 2  ;;  %vm173_vm5 = vcmp.eq.s32.totalorder %v326_v5, 3 }
  0x20   :  { %v195_v19 = vsel %vm73_vm0, 1.0, %v290_v18  ;;  %v58_v52 = vsel %vm54_vm1, %v56_v47, %v194_v46  ;;  %p270_p0 = pnand %p269_p13, %p263_p10 }
  0x21   :  { %v76_v22 = vsub.f32 1.0, %v195_v19  ;;  %v142_v61 = vmul.f32 %v195_v19, %v47_v32 }
  0x23   :  { %v152_v60 = vmul.f32 %v76_v22, %v47_v32 }
  0x26   :  { %v211_v1 = vpop.eup %210 }
  0x27   :  { %196 = vpush %v211_v1 }
  0x58   :  { %s197_s0 = spop %196 }
  0x59   :  { %v77_v9 = vstv %s197_s0 }
  0x5a   :  { %v78_v10 = vmul.f32 %v77_v9, %v53_v8 }
  0x5c   :  { %v79_v11 = vsel %vm73_vm0, %v78_v10, -1e+30  ;;  %v82_v12 = vsel %vm73_vm0, -1e+30, %v78_v10 }
  0x5d   :  { %80 = vmax.xlane.f32.xlu0 %v79_v11 }
  0x61   :  { %83 = vmax.xlane.f32.xlu0 %v82_v12 }
  0xe6   :  { %v81_v13 = vpop.xlane.xlu0 %80 }
  0xea   :  { %v84_v14 = vpop.xlane.xlu0 %83 }
  0xeb   :  { %v85_v15 = vsel %vm73_vm0, %v81_v13, %v84_v14 }
  0xec   :  { %v86_v16 = vsub.f32 %v78_v10, %v85_v15 }
  0xee   :  { %v87_v17 = vmul.f32 1.442695, %v86_v16 }
  0xf0   :  { %212 = vpow2.f32 %v87_v17 }
  0xfd   :  { %v213_v20 = vpop.eup %212 }
  0xfe   :  { %v89_v21 = vmul.f32 %v213_v20, %v195_v19  ;;  %v92_v23 = vmul.f32 %v213_v20, %v76_v22 }
 0x100   :  { %90 = vadd.xlane.f32.xlu1 %v89_v21 }
 0x104   :  { %93 = vadd.xlane.f32.xlu1 %v92_v23 }
 0x189   :  { %v91_v24 = vpop.xlane.xlu1 %90 }
 0x18a   :  { %214 = vrcp.f32 %v91_v24 }
 0x18d   :  { %v94_v25 = vpop.xlane.xlu1 %93 }
 0x18e   :  { %216 = vrcp.f32 %v94_v25 }
 0x197   :  { %v215_v27 = vpop.eup %214 }
 0x198   :  { %v96_v30 = vmul.f32 %v215_v27, %v195_v19 }
 0x19b   :  { %v217_v29 = vpop.eup %216 }
 0x19c   :  { %v98_v31 = vmul.f32 %v217_v29, %v76_v22 }
 0x19e   :  { %v99_v33 = vadd.f32 %v98_v31, %v96_v30 }
 0x1a0   :  { %v100_v34 = vmul.f32 %v213_v20, %v99_v33 }
 0x1a2   :  { %v101_v35 = vmul.f32 %v100_v34, %v47_v32 }
 0x1a4   :  { %v105_v36 = vmul.f32 %v101_v35, %v76_v22  ;;  %v102_v37 = vmul.f32 %v195_v19, %v101_v35 }
 0x1a6   :  { %106 = vadd.xlane.f32.xlu1 %v105_v36  ;;  %103 = vadd.xlane.f32.xlu0 %v102_v37 }
 0x22f   :  { %v107_v38 = vpop.xlane.xlu1 %106  ;;  %v104_v39 = vpop.xlane.xlu0 %103 }
 0x230   :  { %v111_v40 = vadd.f32 1e-06, %v107_v38  ;;  %v108_v41 = vadd.f32 1e-06, %v104_v39 }
 0x232   :  { %218 = vrcp.f32 %v111_v40 }
 0x233   :  { %220 = vrcp.f32 %v108_v41 }
 0x23f   :  { %v219_v44 = vpop.eup %218 }
 0x240   :  { %v221_v45 = vpop.eup %220  ;;  %v113_v48 = vmul.f32 %v219_v44, %v76_v22 }
 0x241   :  { %v110_v49 = vmul.f32 %v221_v45, %v195_v19 }
 0x243   :  { %v114_v51 = vadd.f32 %v113_v48, %v110_v49 }
 0x245   :  { %v115_v53 = vmul.f32 %v114_v51, %v101_v35 }
 0x247   :  { %v116_v55 = vmul.f32 %v115_v53, %v58_v52 }
 0x249   :  { %v120_v56 = vmul.f32 %v119_v54, %v116_v55 }
 0x24b   :  { %v121_v57 = vmul.f32 %v120_v56, %v47_v32 }
 0x24d   :  { %v132_v58 = vmul.f32 %v121_v57, %v76_v22  ;;  %v122_v59 = vmul.f32 %v195_v19, %v121_v57 }
 0x24f   :  { %133 = vadd.xlane.f32.xlu1 %v132_v58  ;;  %123 = vadd.xlane.f32.xlu0 %v122_v59 }
 0x253   :  { %153 = vadd.xlane.f32.xlu1 %v152_v60  ;;  %143 = vadd.xlane.f32.xlu0 %v142_v61 }
 0x2d8   :  { %v134_v62 = vpop.xlane.xlu1 %133  ;;  %v124_v63 = vpop.xlane.xlu0 %123 }
 0x2d9   :  { %v135_v0 = vrot.slane %v134_v62, 4  ;;  %v125_v1 = vrot.slane %v124_v63, 4 }
 0x2db   :  { %v136_v2 = vadd.f32 %v135_v0, %v134_v62  ;;  %v126_v3 = vadd.f32 %v125_v1, %v124_v63 }
 0x2dc   :  { %v154_v4 = vpop.xlane.xlu1 %153  ;;  %v144_v6 = vpop.xlane.xlu0 %143 }
 0x2dd   :  { %v137_v7 = vrot.slane %v136_v2, 2  ;;  %v127_v8 = vrot.slane %v126_v3, 2  ;;  %v155_v9 = vrot.slane %v154_v4, 4  ;;  %v145_v10 = vrot.slane %v144_v6, 4 }
 0x2df   :  { %v156_v11 = vadd.f32 %v155_v9, %v154_v4  ;;  %v146_v12 = vadd.f32 %v145_v10, %v144_v6  ;;  %v128_v13 = vadd.f32 %v127_v8, %v126_v3  ;;  %v138_v14 = vadd.f32 %v137_v7, %v136_v2 }
 0x2e1   :  { %v157_v15 = vrot.slane %v156_v11, 2  ;;  %v147_v16 = vrot.slane %v146_v12, 2  ;;  %v129_v17 = vrot.slane %v128_v13, 1  ;;  %v139_v18 = vrot.slane %v138_v14, 1 }
 0x2e3   :  { %v158_v19 = vadd.f32 %v157_v15, %v156_v11  ;;  %v148_v20 = vadd.f32 %v147_v16, %v146_v12  ;;  %v130_v21 = vadd.f32 %v129_v17, %v128_v13  ;;  %v140_v22 = vadd.f32 %v139_v18, %v138_v14 }
 0x2e5   :  { %198 = vpush %v130_v21  ;;  %v149_v23 = vrot.slane %v148_v20, 1  ;;  %v159_v24 = vrot.slane %v158_v19, 1 }
 0x2e6   :  { %200 = vpush %v140_v22 }
 0x2e7   :  { %v150_v25 = vadd.f32 %v149_v23, %v148_v20  ;;  %v160_v26 = vadd.f32 %v159_v24, %v158_v19 }
 0x2e9   :  { %202 = vpush %v150_v25 }
 0x2ea   :  { %204 = vpush %v160_v26 }
 0x316   :  { %s199_s2 = spop %198 }
 0x317   :  { %s201_s27 = spop %200  ;;  %v163_v27 = vstv %s199_s2 }
 0x318   :  { %v170_v28 = vstv %s201_s27  ;;  %v164_v30 = vsel %vm162_vm2, %v163_v27, 0.0 }
 0x319   :  { %v171_v34 = vsel %vm169_vm4, %v170_v28, 0.0 }
 0x31a   :  { %s203_s28 = spop %202 }
 0x31b   :  { %v166_v29 = vstv %s203_s28  ;;  %s205_s29 = spop %204 }
 0x31c   :  { %v167_v31 = vsel %vm165_vm3, %v166_v29, 0.0  ;;  %v174_v33 = vstv %s205_s29 }
 0x31d   :  { %v168_v32 = vadd.f32 %v167_v31, %v164_v30  ;;  %v175_v36 = vsel %vm173_vm5, %v174_v33, 0.0 }
 0x31f   :  { %v172_v35 = vadd.f32 %v171_v34, %v168_v32 }
 0x321   :  { %v176_v37 = vadd.f32 %v175_v36, %v172_v35 }
 0x323   :  { %177 = vst [vmem:[#allocation8] sm:$0xff] %v176_v37 }
 0x324   :  { %273 = shalt.err (!%p270_p0)
}
 0x325   :  { %187 = dma.vmem_to_hbm [thread:$0]  %s185_s5, 128, %s343_s4, [#allocation5]  }
 0x326   :  { %286 = dma.done.wait [#allocation5], 128  }
 0x327   :  { %287 = vsyncadd [#allocation5], 4294967168 }
 0x328   :  { %191 = vsyncpa [#allocation4], 1 }
 0x329   :  { %192 = vsyncpa [#allocation7], 1 }
 0x32a   :  { %193 = vsyncpa [#allocation5], 1 }

</bundles_post_ra>
